<compile_context>
chip_gen: v5e
topology: v5e:2x2
jax: 0.10.0
libtpu: 0.0.40
codegen_flags: <defaults>
</compile_context>

<pallas_src>
import jax
import jax.numpy as jnp
from jax.experimental import pallas as pl
from jax.experimental.pallas import tpu as pltpu


def _round_up(n, m):
    return ((n + m - 1) // m) * m


def _vmem_limit_bytes():
    # Generation-aware VMEM budget: leave ~16 MiB headroom for Mosaic internal
    # scratch / in-kernel intermediates, cap at ~100 MiB (v5e/v6e have 128 MiB
    # physical VMEM; v7x has 64 MiB per TensorCore -> ~48 MiB requested).
    try:
        cap = int(pltpu.get_tpu_info().vmem_capacity_bytes)
    except Exception:  # pragma: no cover - conservative fallback
        cap = 64 * 1024 * 1024
    return max(32 * 1024 * 1024, min(cap - 16 * 1024 * 1024, 100 * 1024 * 1024))


def _feature_extraction_kernel(x_ref, wgl_ref, wf_ref, beff_ref, out_ref, gl_acc):
    # x_ref:   (TM, TK)      wgl_ref: (TK, Gp)
    # wf_ref:  (Gp, Hp)      beff_ref: (1, Hp) f32
    # out_ref: (TM, Hp)      gl_acc:  (TM, Gp) f32 scratch
    k = pl.program_id(1)

    @pl.when(k == 0)
    def _():
        gl_acc[...] = jnp.zeros_like(gl_acc)

    # GEMM 1 (partial over K): fused global+local projection, f32 accumulate.
    gl_acc[...] += jnp.dot(x_ref[...], wgl_ref[...],
                           preferred_element_type=jnp.float32)

    @pl.when(k == pl.num_programs(1) - 1)
    def _():
        # GEMM 2: fusion linear on the accumulated (TM, 2H) activations.
        gl = gl_acc[...].astype(wf_ref.dtype)
        out = jnp.dot(gl, wf_ref[...], preferred_element_type=jnp.float32)
        out_ref[...] = (out + beff_ref[...]).astype(out_ref.dtype)


def feature_extraction(x, params, *, tm=512, compute_dtype=jnp.bfloat16):
    """x: (..., input_dim) -> (..., hidden_dim)."""
    wg, bg, wl, bl, wf, bf = params   # wg/wl: (D,H)  wf: (2H,H)  biases: (1,H)
    D = x.shape[-1]
    H = wg.shape[1]
    lead = x.shape[:-1]
    out_dtype = x.dtype
    cdt = jnp.dtype(compute_dtype) if compute_dtype is not None else jnp.dtype(x.dtype)

    x2d = x.reshape(-1, D)
    M = x2d.shape[0]

    # ---- weight / bias preparation (trace-time, outside the kernel) -------
    wgl = jnp.concatenate([wg, wl], axis=1)                     # (D, 2H)
    bgl = jnp.concatenate([bg, bl], axis=1)                     # (1, 2H)
    b_eff = (bgl.astype(jnp.float32) @ wf.astype(jnp.float32)
             + bf.astype(jnp.float32))                          # (1, H) f32

    cd_size = cdt.itemsize
    out_size = jnp.dtype(out_dtype).itemsize
    # sublane packing: 8 rows/vreg for 4B dtypes, 16 for 2B, 32 for 1B.
    row_mult = {4: 8, 2: 16, 1: 32}.get(cd_size, 8)

    # ---- lane-dense padding (last dims -> multiples of 128) ---------------
    Gp = _round_up(2 * H, 128)
    Hp = _round_up(H, 128)

    # ---- K (input_dim) tiling: bound the Wgl K-slab to ~8 MiB -------------
    vmem_limit = _vmem_limit_bytes()
    max_wgl_block = 8 * 1024 * 1024
    tk = _round_up(D, 128)
    if tk * Gp * cd_size > max_wgl_block:
        tk = max(128, (max_wgl_block // (Gp * cd_size)) // 128 * 128)
    Dp = _round_up(D, tk)
    nk = Dp // tk

    # ---- M (row) tiling ----------------------------------------------------
    tm_eff = min(int(tm), _round_up(M, row_mult))
    if M > int(tm):
        # Guarantee >= 2 balanced grid steps so both v7x TensorCores get work.
        tm_eff = min(int(tm), _round_up(-(-M // 2), row_mult))

    def vmem_estimate(tm_):
        wgl_bufs = 2 if nk > 1 else 1
        return (2 * tm_ * tk * cd_size            # x tile (double-buffered)
                + wgl_bufs * tk * Gp * cd_size    # Wgl K-slab
                + Gp * Hp * cd_size               # Wf (single-buffered)
                + Hp * 4                          # b_eff
                + 2 * tm_ * Hp * out_size         # out tile (double-buffered)
                + tm_ * Gp * 4)                   # f32 gl accumulator scratch

    while tm_eff > row_mult and vmem_estimate(tm_eff) > int(0.8 * vmem_limit):
        tm_eff = _round_up(tm_eff // 2, row_mult)
    Mp = _round_up(M, tm_eff)

    # ---- pad / cast operands (skip materialized pad when already aligned) --
    def fit(a, shape, dtype, rows, cols):
        a = a.astype(dtype)
        if a.shape == shape:
            return a
        return jnp.zeros(shape, dtype).at[:rows, :cols].set(a)

    x_p = fit(x2d, (Mp, Dp), cdt, M, D)
    wgl_p = fit(wgl, (Dp, Gp), cdt, D, 2 * H)
    wf_p = fit(wf, (Gp, Hp), cdt, 2 * H, H)
    beff_p = fit(b_eff, (1, Hp), jnp.float32, 1, H)

    grid = (Mp // tm_eff, nk)
    cost = pl.CostEstimate(
        flops=2 * Mp * Dp * Gp + 2 * Mp * Gp * Hp,
        transcendentals=0,
        bytes_accessed=(Mp * Dp + Dp * Gp + Gp * Hp) * cd_size
        + Mp * Hp * out_size + Hp * 4,
    )

    def build_call(single_buffer_resident):
        res_kw = ({"pipeline_mode": pl.Buffered(1)}
                  if single_buffer_resident else {})
        wgl_kw = ({"pipeline_mode": pl.Buffered(1)}
                  if (single_buffer_resident and nk == 1) else {})
        return pl.pallas_call(
            _feature_extraction_kernel,
            out_shape=jax.ShapeDtypeStruct((Mp, Hp), out_dtype),
            grid_spec=pltpu.PrefetchScalarGridSpec(
                num_scalar_prefetch=0,
                grid=grid,
                in_specs=[
                    pl.BlockSpec((tm_eff, tk), lambda i, k: (i, k)),     # x
                    pl.BlockSpec((tk, Gp), lambda i, k: (k, 0), **wgl_kw),  # Wgl
                    pl.BlockSpec((Gp, Hp), lambda i, k: (0, 0), **res_kw),  # Wf
                    pl.BlockSpec((1, Hp), lambda i, k: (0, 0), **res_kw),   # b_eff
                ],
                out_specs=pl.BlockSpec((tm_eff, Hp), lambda i, k: (i, 0)),
                scratch_shapes=[pltpu.VMEM((tm_eff, Gp), jnp.float32)],
            ),
            compiler_params=pltpu.CompilerParams(
                dimension_semantics=("parallel", "arbitrary"),
                vmem_limit_bytes=vmem_limit,
            ),
            cost_estimate=cost,
        )

    try:
        out_p = build_call(True)(x_p, wgl_p, wf_p, beff_p)
    except Exception:
        # TODO(synk): drop this fallback once pl.Buffered(1) single-buffering
        # is guaranteed on the deployed jax/libtpu version.
        out_p = build_call(False)(x_p, wgl_p, wf_p, beff_p)

    out = out_p if (Mp, Hp) == (M, H) else out_p[:M, :H]
    return out.reshape(*lead, H)


def init_params(key, input_dim, hidden_dim, dtype=jnp.float32):
    """Deterministic init mirroring nn.Linear default U(-1/sqrt(fan_in), ...)."""
    ks = jax.random.split(key, 6)

    def lin(kw, kb, fan_in, fan_out):
        bound = 1.0 / jnp.sqrt(fan_in)
        w = jax.random.uniform(kw, (fan_out, fan_in), dtype, -bound, bound)
        b = jax.random.uniform(kb, (fan_out,), dtype, -bound, bound)
        # pre-transpose weight to (in, out); bias to (1, out)
        return w.T, b.reshape(1, fan_out)

    wg, bg = lin(ks[0], ks[1], input_dim, hidden_dim)
    wl, bl = lin(ks[2], ks[3], input_dim, hidden_dim)
    wf, bf = lin(ks[4], ks[5], 2 * hidden_dim, hidden_dim)
    return (wg, bg, wl, bl, wf, bf)


def reference(x, params):
    wg, bg, wl, bl, wf, bf = params
    g = x @ wg + bg[0]
    l = x @ wl + bl[0]
    fused = jnp.concatenate([g, l], axis=-1)
    return fused @ wf + bf[0]


if __name__ == "__main__":
    key = jax.random.PRNGKey(0)
    k_params, k_x = jax.random.split(key)

    B, S, input_dim, hidden_dim = 2, 8, 16, 32
    params = init_params(k_params, input_dim, hidden_dim)
    x = jax.random.normal(k_x, (B, S, input_dim), dtype=jnp.float32)

    ref = reference(x, params)

    # f32 compute path: tight tolerance vs the pure-JAX reference.
    out_f32 = jax.block_until_ready(
        feature_extraction(x, params, compute_dtype=jnp.float32))
    assert out_f32.shape == (B, S, hidden_dim)
    assert jnp.allclose(out_f32, ref, atol=1e-4, rtol=1e-4), "f32 mismatch"

    # Default bf16 compute path (f32 accumulation): looser tolerance.
    out_bf16 = jax.block_until_ready(feature_extraction(x, params))
    assert out_bf16.shape == (B, S, hidden_dim)
    assert jnp.allclose(out_bf16, ref, atol=1e-1, rtol=5e-2), "bf16 mismatch"

    print("KERNEL_OK")
</pallas_src>

<mosaic_0001>
module attributes {stable_mosaic.version = 11 : i64} {
  func.func @_feature_extraction_kernel(%arg0: i32, %arg1: i32, %arg2: memref<16x128xf32, #tpu.memory_space<vmem>>, %arg3: memref<128x128xf32, #tpu.memory_space<vmem>>, %arg4: memref<128x128xf32, #tpu.memory_space<vmem>>, %arg5: memref<1x128xf32, #tpu.memory_space<vmem>>, %arg6: memref<16x128xf32, #tpu.memory_space<vmem>>, %arg7: memref<16x128xf32, #tpu.memory_space<vmem>>) attributes {dimension_semantics = [#tpu.dimension_semantics<parallel>, #tpu.dimension_semantics<arbitrary>], iteration_bounds = array<i64: 1, 1>, scalar_prefetch = 0 : i64, scratch_operands = 1 : i64, tpu.core_type = #tpu.core_type<tc>, window_params = [{transform_indices = @transform_0, window_bounds = array<i64: 16, 128>}, {pipeline_mode = #tpu.pipeline_mode<synchronous>, transform_indices = @transform_1, window_bounds = array<i64: 128, 128>}, {pipeline_mode = #tpu.pipeline_mode<synchronous>, transform_indices = @transform_2, window_bounds = array<i64: 128, 128>}, {pipeline_mode = #tpu.pipeline_mode<synchronous>, transform_indices = @transform_3, window_bounds = array<i64: 1, 128>}, {transform_indices = @transform_4, window_bounds = array<i64: 16, 128>}]} {
    %c0_i32 = arith.constant 0 : i32
    %0 = arith.cmpi eq, %arg1, %c0_i32 : i32
    %1 = arith.extui %0 : i1 to i32
    %c0_i32_0 = arith.constant 0 : i32
    %2 = arith.cmpi ne, %1, %c0_i32_0 : i32
    scf.if %2 {
      %cst_10 = arith.constant 0.000000e+00 : f32
      %12 = vector.broadcast %cst_10 : f32 to vector<16x128xf32>
      %c0_11 = arith.constant 0 : index
      %c0_12 = arith.constant 0 : index
      %13 = vector.load %arg7[%c0_11, %c0_12] : memref<16x128xf32, #tpu.memory_space<vmem>>, vector<16x128xf32>
      tpu.vector_store %arg7[%c0_11, %c0_12], %12 {strides = array<i32>} : memref<16x128xf32, #tpu.memory_space<vmem>>, vector<16x128xf32>,
    } else {
    }
    %c0 = arith.constant 0 : index
    %c0_1 = arith.constant 0 : index
    %3 = vector.load %arg7[%c0, %c0_1] : memref<16x128xf32, #tpu.memory_space<vmem>>, vector<16x128xf32>
    %c0_2 = arith.constant 0 : index
    %c0_3 = arith.constant 0 : index
    %4 = vector.load %arg2[%c0_2, %c0_3] : memref<16x128xf32, #tpu.memory_space<vmem>>, vector<16x128xf32>
    %c0_4 = arith.constant 0 : index
    %c0_5 = arith.constant 0 : index
    %5 = vector.load %arg3[%c0_4, %c0_5] : memref<128x128xf32, #tpu.memory_space<vmem>>, vector<128x128xf32>
    %cst = arith.constant dense<0.000000e+00> : vector<16x128xf32>
    %6 = tpu.matmul %4, %5, %cst {dimension_numbers = #tpu.dot_dimension_numbers<[1], [0], [0], [1], [0, 0, 1, 1], [], []>} : vector<16x128xf32>, vector<128x128xf32>, vector<16x128xf32> -> vector<16x128xf32>
    %7 = arith.addf %3, %6 : vector<16x128xf32>
    %c0_6 = arith.constant 0 : index
    %c0_7 = arith.constant 0 : index
    %8 = vector.load %arg7[%c0_6, %c0_7] : memref<16x128xf32, #tpu.memory_space<vmem>>, vector<16x128xf32>
    tpu.vector_store %arg7[%c0_6, %c0_7], %7 {strides = array<i32>} : memref<16x128xf32, #tpu.memory_space<vmem>>, vector<16x128xf32>,
    %c0_i32_8 = arith.constant 0 : i32
    %9 = arith.cmpi eq, %arg1, %c0_i32_8 : i32
    %10 = arith.extui %9 : i1 to i32
    %c0_i32_9 = arith.constant 0 : i32
    %11 = arith.cmpi ne, %10, %c0_i32_9 : i32
    scf.if %11 {
      %c0_10 = arith.constant 0 : index
      %c0_11 = arith.constant 0 : index
      %12 = vector.load %arg7[%c0_10, %c0_11] : memref<16x128xf32, #tpu.memory_space<vmem>>, vector<16x128xf32>
      %c0_12 = arith.constant 0 : index
      %c0_13 = arith.constant 0 : index
      %13 = vector.load %arg4[%c0_12, %c0_13] : memref<128x128xf32, #tpu.memory_space<vmem>>, vector<128x128xf32>
      %cst_14 = arith.constant dense<0.000000e+00> : vector<16x128xf32>
      %14 = tpu.matmul %12, %13, %cst_14 {dimension_numbers = #tpu.dot_dimension_numbers<[1], [0], [0], [1], [0, 0, 1, 1], [], []>} : vector<16x128xf32>, vector<128x128xf32>, vector<16x128xf32> -> vector<16x128xf32>
      %c0_15 = arith.constant 0 : index
      %c0_16 = arith.constant 0 : index
      %15 = vector.load %arg5[%c0_15, %c0_16] : memref<1x128xf32, #tpu.memory_space<vmem>>, vector<1x128xf32>
      %16 = vector.broadcast %15 : vector<1x128xf32> to vector<16x128xf32>
      %17 = arith.addf %14, %16 : vector<16x128xf32>
      %c0_17 = arith.constant 0 : index
      %c0_18 = arith.constant 0 : index
      %18 = vector.load %arg6[%c0_17, %c0_18] : memref<16x128xf32, #tpu.memory_space<vmem>>, vector<16x128xf32>
      tpu.vector_store %arg6[%c0_17, %c0_18], %17 {strides = array<i32>} : memref<16x128xf32, #tpu.memory_space<vmem>>, vector<16x128xf32>,
    } else {
    }
    return
  }
  func.func @transform_0(%arg0: i32, %arg1: i32) -> (i32, i32) {
    %c0_i32 = arith.constant 0 : i32
    return %arg0, %arg1 : i32, i32
  }
  func.func @transform_1(%arg0: i32, %arg1: i32) -> (i32, i32) {
    %c0_i32 = arith.constant 0 : i32
    %c0_i32_0 = arith.constant 0 : i32
    return %arg1, %c0_i32 : i32, i32
  }
  func.func @transform_2(%arg0: i32, %arg1: i32) -> (i32, i32) {
    %c0_i32 = arith.constant 0 : i32
    %c0_i32_0 = arith.constant 0 : i32
    %c0_i32_1 = arith.constant 0 : i32
    return %c0_i32, %c0_i32_0 : i32, i32
  }
  func.func @transform_3(%arg0: i32, %arg1: i32) -> (i32, i32) {
    %c0_i32 = arith.constant 0 : i32
    %c0_i32_0 = arith.constant 0 : i32
    %c0_i32_1 = arith.constant 0 : i32
    return %c0_i32, %c0_i32_0 : i32, i32
  }
  func.func @transform_4(%arg0: i32, %arg1: i32) -> (i32, i32) {
    %c0_i32 = arith.constant 0 : i32
    %c0_i32_0 = arith.constant 0 : i32
    return %arg0, %c0_i32 : i32, i32
  }
}

module attributes {stable_mosaic.version = 11 : i64} {
  func.func @_feature_extraction_kernel(%arg0: i32, %arg1: i32, %arg2: memref<16x128xf32, #tpu.memory_space<vmem>>, %arg3: memref<128x128xf32, #tpu.memory_space<vmem>>, %arg4: memref<128x128xf32, #tpu.memory_space<vmem>>, %arg5: memref<1x128xf32, #tpu.memory_space<vmem>>, %arg6: memref<16x128xf32, #tpu.memory_space<vmem>>, %arg7: memref<16x128xf32, #tpu.memory_space<vmem>>) attributes {dimension_semantics = [#tpu.dimension_semantics<parallel>, #tpu.dimension_semantics<arbitrary>], iteration_bounds = array<i64: 1, 1>, scalar_prefetch = 0 : i64, scratch_operands = 1 : i64, tpu.core_type = #tpu.core_type<tc>, window_params = [{transform_indices = @transform_0, window_bounds = array<i64: 16, 128>}, {transform_indices = @transform_1, window_bounds = array<i64: 128, 128>}, {pipeline_mode = #tpu.pipeline_mode<synchronous>, transform_indices = @transform_2, window_bounds = array<i64: 128, 128>}, {pipeline_mode = #tpu.pipeline_mode<synchronous>, transform_indices = @transform_3, window_bounds = array<i64: 1, 128>}, {transform_indices = @transform_4, window_bounds = array<i64: 16, 128>}]} {
    %c0_i32 = arith.constant 0 : i32
    %0 = arith.cmpi eq, %arg1, %c0_i32 : i32
    %1 = arith.extui %0 : i1 to i32
    %c0_i32_0 = arith.constant 0 : i32
    %2 = arith.cmpi ne, %1, %c0_i32_0 : i32
    scf.if %2 {
      %cst_10 = arith.constant 0.000000e+00 : f32
      %12 = vector.broadcast %cst_10 : f32 to vector<16x128xf32>
      %c0_11 = arith.constant 0 : index
      %c0_12 = arith.constant 0 : index
      %13 = vector.load %arg7[%c0_11, %c0_12] : memref<16x128xf32, #tpu.memory_space<vmem>>, vector<16x128xf32>
      tpu.vector_store %arg7[%c0_11, %c0_12], %12 {strides = array<i32>} : memref<16x128xf32, #tpu.memory_space<vmem>>, vector<16x128xf32>,
    } else {
    }
    %c0 = arith.constant 0 : index
    %c0_1 = arith.constant 0 : index
    %3 = vector.load %arg7[%c0, %c0_1] : memref<16x128xf32, #tpu.memory_space<vmem>>, vector<16x128xf32>
    %c0_2 = arith.constant 0 : index
    %c0_3 = arith.constant 0 : index
    %4 = vector.load %arg2[%c0_2, %c0_3] : memref<16x128xf32, #tpu.memory_space<vmem>>, vector<16x128xf32>
    %c0_4 = arith.constant 0 : index
    %c0_5 = arith.constant 0 : index
    %5 = vector.load %arg3[%c0_4, %c0_5] : memref<128x128xf32, #tpu.memory_space<vmem>>, vector<128x128xf32>
    %cst = arith.constant dense<0.000000e+00> : vector<16x128xf32>
    %6 = tpu.matmul %4, %5, %cst {dimension_numbers = #tpu.dot_dimension_numbers<[1], [0], [0], [1], [0, 0, 1, 1], [], []>} : vector<16x128xf32>, vector<128x128xf32>, vector<16x128xf32> -> vector<16x128xf32>
    %7 = arith.addf %3, %6 : vector<16x128xf32>
    %c0_6 = arith.constant 0 : index
    %c0_7 = arith.constant 0 : index
    %8 = vector.load %arg7[%c0_6, %c0_7] : memref<16x128xf32, #tpu.memory_space<vmem>>, vector<16x128xf32>
    tpu.vector_store %arg7[%c0_6, %c0_7], %7 {strides = array<i32>} : memref<16x128xf32, #tpu.memory_space<vmem>>, vector<16x128xf32>,
    %c0_i32_8 = arith.constant 0 : i32
    %9 = arith.cmpi eq, %arg1, %c0_i32_8 : i32
    %10 = arith.extui %9 : i1 to i32
    %c0_i32_9 = arith.constant 0 : i32
    %11 = arith.cmpi ne, %10, %c0_i32_9 : i32
    scf.if %11 {
      %c0_10 = arith.constant 0 : index
      %c0_11 = arith.constant 0 : index
      %12 = vector.load %arg7[%c0_10, %c0_11] : memref<16x128xf32, #tpu.memory_space<vmem>>, vector<16x128xf32>
      %c0_12 = arith.constant 0 : index
      %c0_13 = arith.constant 0 : index
      %13 = vector.load %arg4[%c0_12, %c0_13] : memref<128x128xf32, #tpu.memory_space<vmem>>, vector<128x128xf32>
      %cst_14 = arith.constant dense<0.000000e+00> : vector<16x128xf32>
      %14 = tpu.matmul %12, %13, %cst_14 {dimension_numbers = #tpu.dot_dimension_numbers<[1], [0], [0], [1], [0, 0, 1, 1], [], []>} : vector<16x128xf32>, vector<128x128xf32>, vector<16x128xf32> -> vector<16x128xf32>
      %c0_15 = arith.constant 0 : index
      %c0_16 = arith.constant 0 : index
      %15 = vector.load %arg5[%c0_15, %c0_16] : memref<1x128xf32, #tpu.memory_space<vmem>>, vector<1x128xf32>
      %16 = vector.broadcast %15 : vector<1x128xf32> to vector<16x128xf32>
      %17 = arith.addf %14, %16 : vector<16x128xf32>
      %c0_17 = arith.constant 0 : index
      %c0_18 = arith.constant 0 : index
      %18 = vector.load %arg6[%c0_17, %c0_18] : memref<16x128xf32, #tpu.memory_space<vmem>>, vector<16x128xf32>
      tpu.vector_store %arg6[%c0_17, %c0_18], %17 {strides = array<i32>} : memref<16x128xf32, #tpu.memory_space<vmem>>, vector<16x128xf32>,
    } else {
    }
    return
  }
  func.func @transform_0(%arg0: i32, %arg1: i32) -> (i32, i32) {
    %c0_i32 = arith.constant 0 : i32
    return %arg0, %arg1 : i32, i32
  }
  func.func @transform_1(%arg0: i32, %arg1: i32) -> (i32, i32) {
    %c0_i32 = arith.constant 0 : i32
    %c0_i32_0 = arith.constant 0 : i32
    return %arg1, %c0_i32 : i32, i32
  }
  func.func @transform_2(%arg0: i32, %arg1: i32) -> (i32, i32) {
    %c0_i32 = arith.constant 0 : i32
    %c0_i32_0 = arith.constant 0 : i32
    %c0_i32_1 = arith.constant 0 : i32
    return %c0_i32, %c0_i32_0 : i32, i32
  }
  func.func @transform_3(%arg0: i32, %arg1: i32) -> (i32, i32) {
    %c0_i32 = arith.constant 0 : i32
    %c0_i32_0 = arith.constant 0 : i32
    %c0_i32_1 = arith.constant 0 : i32
    return %c0_i32, %c0_i32_0 : i32, i32
  }
  func.func @transform_4(%arg0: i32, %arg1: i32) -> (i32, i32) {
    %c0_i32 = arith.constant 0 : i32
    %c0_i32_0 = arith.constant 0 : i32
    return %arg0, %c0_i32 : i32, i32
  }
}

</mosaic_0001>

<bundles_post_ra>
// kernel: tpu_custom_call.1
= control target key start
LH: loop header
LB: loop body
LE: loop exit
PB: predicated region body
PF: predicated region fallthrough
CT: control target
= control target key end

     0   :  { %9 = vsyncpa [#allocation4], 0  ;;  %s387_s0 = inlined_call_operand.hbm [shape: f32[16,128], index: 0, kind: input, shape index: {}]   ;;  %s388_s1 = inlined_call_operand.hbm [shape: f32[128,128], index: 1, kind: input, shape index: {}]   ;;  %s389_s2 = inlined_call_operand.hbm [shape: f32[128,128], index: 2, kind: input, shape index: {}]   ;;  %s390_s3 = inlined_call_operand.vmem [shape: f32[1,128], index: 3, kind: input, shape index: {}]   ;;  %s391_s4 = inlined_call_operand.hbm [shape: f32[16,128], index: 4, kind: output, shape index: {}]  }
   0x1   :  { %10 = vsyncpa [#allocation7], 0 }
   0x2   :  { %11 = vsyncpa [#allocation5], 0  ;;  %s29_s17 = sshll.u32 %s388_s1, 4  ;;  %s329_s18 = smov [#allocation6]   ;;  %s30_s17 = int_to_ptr.hbm [resolvable:$true] %s29_s17 }
   0x3   :  { %s31_s19 = sshll.u32 %s329_s18, 4  ;;  %s16_s22 = sshll.u32 %s387_s0, 4  ;;  %s32_s19 = int_to_ptr.vmem [resolvable:$true] %s31_s19  ;;  %s17_s22 = int_to_ptr.hbm [resolvable:$true] %s16_s22 }
   0x4   :  { %s330_s23 = smov 128   ;;  %s331_s24 = smov 8  }
   0x5   :  { %37 = dma.hbm_to_vmem [thread:$0]  %s30_s17, 2048, %s32_s19, [#allocation7], %s330_s23, %s330_s23, %s331_s24  }
   0x6   :  { %s332_s25 = smov [#allocation3]   ;;  %s42_s1 = sshll.u32 %s389_s2, 4  ;;  %s43_s1 = int_to_ptr.hbm [resolvable:$true] %s42_s1 }
   0x7   :  { %s18_s26 = sshll.u32 %s332_s25, 4  ;;  %s333_s0 = smov [#allocation8]   ;;  %s19_s26 = int_to_ptr.vmem [resolvable:$true] %s18_s26 }
   0x8   :  { %24 = dma.hbm_to_vmem [thread:$0]  %s17_s22, 256, %s19_s26, [#allocation4], %s330_s23, %s330_s23, %s331_s24  }
   0x9   :  { %s44_s29 = sshll.u32 %s333_s0, 4  ;;  %s45_s29 = int_to_ptr.vmem [resolvable:$true] %s44_s29 }
   0xa   :  { %50 = dma.hbm_to_vmem [thread:$0]  %s43_s1, 2048, %s45_s29, [#allocation7], %s330_s23, %s330_s23, %s331_s24  }
   0xb   :  { %323 = dma.done.wait [#allocation4], 256  }
   0xc   :  { %324 = vsyncadd [#allocation4], 4294967040 }
   0xd   :  { %325 = dma.done.wait [#allocation7], 4096  }
   0xe   :  { %326 = vsyncadd [#allocation7], 4294963200  ;;  %v90_v0 = vld [vmem:[#allocation6 + $0x78] sm:$0xff]  ;;  %v89_v1 = vld [vmem:[#allocation6 + $0x70] sm:$0xff]  ;;  %s334_s5 = smov [#allocation9]   ;;  %s174_s9 = sshll.u32 %s391_s4, 4  ;;  %s175_s9 = int_to_ptr.hbm [resolvable:$true] %s174_s9 }
   0xf   :  { %188 = vmatpush.msra.mxu2 %v90_v0  ;;  %91 = vmatpush.msra.mxu0 %v90_v0  ;;  %v88_v2 = vld [vmem:[#allocation6 + $0x68] sm:$0xff]  ;;  %v87_v3 = vld [vmem:[#allocation6 + $0x60] sm:$0xff]  ;;  %v86_v4 = vld [vmem:[#allocation6 + $0x58] sm:$0xff]  ;;  %s172_s6 = sshll.u32 %s334_s5, 4  ;;  %s173_s6 = int_to_ptr.vmem [resolvable:$true] %s172_s6 }
  0x10   :  { %v138_v5 = vld [vmem:[#allocation8 + $0x78] sm:$0xff]  ;;  %v137_v6 = vld [vmem:[#allocation8 + $0x70] sm:$0xff]  ;;  %v136_v8 = vld [vmem:[#allocation8 + $0x68] sm:$0xff] }
  0x11   :  { %189 = vmatpush.msra.mxu2 %v89_v1  ;;  %92 = vmatpush.msra.mxu0 %v89_v1  ;;  %v85_v7 = vld [vmem:[#allocation6 + $0x50] sm:$0xff]  ;;  %v84_v9 = vld [vmem:[#allocation6 + $0x48] sm:$0xff]  ;;  %v135_v10 = vld [vmem:[#allocation8 + $0x60] sm:$0xff] }
  0x12   :  { %204 = vmatpush.msra.mxu3 %v138_v5  ;;  %143 = vmatpush.msra.mxu1 %v138_v5  ;;  %v83_v11 = vld [vmem:[#allocation6 + $0x40] sm:$0xff]  ;;  %v134_v12 = vld [vmem:[#allocation8 + $0x58] sm:$0xff]  ;;  %v133_v14 = vld [vmem:[#allocation8 + $0x50] sm:$0xff] }
  0x13   :  { %190 = vmatpush.msra.mxu2 %v88_v2  ;;  %93 = vmatpush.msra.mxu0 %v88_v2  ;;  %v82_v13 = vld [vmem:[#allocation6 + $0x38] sm:$0xff]  ;;  %v81_v15 = vld [vmem:[#allocation6 + $0x30] sm:$0xff]  ;;  %v132_v16 = vld [vmem:[#allocation8 + $0x48] sm:$0xff] }
  0x14   :  { %205 = vmatpush.msra.mxu3 %v137_v6  ;;  %144 = vmatpush.msra.mxu1 %v137_v6  ;;  %v80_v17 = vld [vmem:[#allocation6 + $0x28] sm:$0xff]  ;;  %v131_v18 = vld [vmem:[#allocation8 + $0x40] sm:$0xff]  ;;  %v130_v20 = vld [vmem:[#allocation8 + $0x38] sm:$0xff] }
  0x15   :  { %191 = vmatpush.msra.mxu2 %v87_v3  ;;  %94 = vmatpush.msra.mxu0 %v87_v3  ;;  %v79_v19 = vld [vmem:[#allocation6 + $0x20] sm:$0xff]  ;;  %v78_v21 = vld [vmem:[#allocation6 + $0x18] sm:$0xff]  ;;  %v129_v22 = vld [vmem:[#allocation8 + $0x30] sm:$0xff] }
  0x16   :  { %206 = vmatpush.msra.mxu3 %v136_v8  ;;  %145 = vmatpush.msra.mxu1 %v136_v8  ;;  %v77_v23 = vld [vmem:[#allocation6 + $0x10] sm:$0xff]  ;;  %v128_v24 = vld [vmem:[#allocation8 + $0x28] sm:$0xff]  ;;  %v127_v26 = vld [vmem:[#allocation8 + $0x20] sm:$0xff] }
  0x17   :  { %192 = vmatpush.msra.mxu2 %v86_v4  ;;  %95 = vmatpush.msra.mxu0 %v86_v4  ;;  %v76_v25 = vld [vmem:[#allocation6 + $0x8] sm:$0xff]  ;;  %v75_v27 = vld [vmem:[#allocation6] sm:$0xff]  ;;  %v74_v28 = vld [vmem:[#allocation3 + $0x8] sm:$0xff] }
  0x18   :  { %207 = vmatpush.msra.mxu3 %v135_v10  ;;  %146 = vmatpush.msra.mxu1 %v135_v10  ;;  %v73_v29 = vld [vmem:[#allocation3] sm:$0xff]  ;;  %v126_v30 = vld [vmem:[#allocation8 + $0x18] sm:$0xff]  ;;  %v124_v32 = vld [vmem:[#allocation8 + $0x8] sm:$0xff] }
  0x19   :  { %193 = vmatpush.msra.mxu2 %v85_v7  ;;  %96 = vmatpush.msra.mxu0 %v85_v7  ;;  %v125_v31 = vld [vmem:[#allocation8 + $0x10] sm:$0xff]  ;;  %v123_v33 = vld [vmem:[#allocation8] sm:$0xff] }
  0x1a   :  { %208 = vmatpush.msra.mxu3 %v134_v12  ;;  %147 = vmatpush.msra.mxu1 %v134_v12  ;;  %v226_v36 = vld [vmem:[%s390_s3] ss:$0 sm:$0xff] }
  0x1b   :  { %194 = vmatpush.msra.mxu2 %v84_v9  ;;  %97 = vmatpush.msra.mxu0 %v84_v9 }
  0x1c   :  { %209 = vmatpush.msra.mxu3 %v133_v14  ;;  %148 = vmatpush.msra.mxu1 %v133_v14 }
  0x1d   :  { %195 = vmatpush.msra.mxu2 %v83_v11  ;;  %98 = vmatpush.msra.mxu0 %v83_v11 }
  0x1e   :  { %210 = vmatpush.msra.mxu3 %v132_v16  ;;  %149 = vmatpush.msra.mxu1 %v132_v16 }
  0x1f   :  { %196 = vmatpush.msra.mxu2 %v82_v13  ;;  %99 = vmatpush.msra.mxu0 %v82_v13 }
  0x20   :  { %211 = vmatpush.msra.mxu3 %v131_v18  ;;  %150 = vmatpush.msra.mxu1 %v131_v18 }
  0x21   :  { %197 = vmatpush.msra.mxu2 %v81_v15  ;;  %100 = vmatpush.msra.mxu0 %v81_v15 }
  0x22   :  { %212 = vmatpush.msra.mxu3 %v130_v20  ;;  %151 = vmatpush.msra.mxu1 %v130_v20 }
  0x23   :  { %198 = vmatpush.msra.mxu2 %v80_v17  ;;  %101 = vmatpush.msra.mxu0 %v80_v17 }
  0x24   :  { %213 = vmatpush.msra.mxu3 %v129_v22  ;;  %152 = vmatpush.msra.mxu1 %v129_v22 }
  0x25   :  { %199 = vmatpush.msra.mxu2 %v79_v19  ;;  %102 = vmatpush.msra.mxu0 %v79_v19 }
  0x26   :  { %214 = vmatpush.msra.mxu3 %v128_v24  ;;  %153 = vmatpush.msra.mxu1 %v128_v24 }
  0x27   :  { %200 = vmatpush.msra.mxu2 %v78_v21  ;;  %103 = vmatpush.msra.mxu0 %v78_v21 }
  0x28   :  { %215 = vmatpush.msra.mxu3 %v127_v26  ;;  %154 = vmatpush.msra.mxu1 %v127_v26 }
  0x29   :  { %201 = vmatpush.msra.mxu2 %v77_v23  ;;  %104 = vmatpush.msra.mxu0 %v77_v23 }
  0x2a   :  { %216 = vmatpush.msra.mxu3 %v126_v30  ;;  %155 = vmatpush.msra.mxu1 %v126_v30 }
  0x2b   :  { %202 = vmatpush.msra.mxu2 %v76_v25  ;;  %105 = vmatpush.msra.mxu0 %v76_v25 }
  0x2c   :  { %217 = vmatpush.msra.mxu3 %v125_v31  ;;  %156 = vmatpush.msra.mxu1 %v125_v31 }
  0x2d   :  { %203 = vmatpush.msra.mxu2 %v75_v27  ;;  %106 = vmatpush.msra.mxu0 %v75_v27 }
  0x2e   :  { %110 = vmatmul.f32.vlgmr.msra.gmra.mxu2 %v74_v28  ;;  %107 = vmatmul.f32.vlgmr.msra.gmra.mxu0 %v73_v29 }
  0x2f   :  { %218 = vmatpush.msra.mxu3 %v124_v32  ;;  %157 = vmatpush.msra.mxu1 %v124_v32 }
  0x31   :  { %219 = vmatpush.msra.mxu3 %v123_v33  ;;  %158 = vmatpush.msra.mxu1 %v123_v33 }
  0xab   :  { %v108_v34 = vpop.f32.mrf.mxu0 }
  0xac   :  { %159 = vmatmul.f32.vlgmr.msra.gmra.mxu1 %v108_v34 }
  0xb1   :  { %v111_v35 = vpop.f32.mrf.mxu2 }
  0xb2   :  { %162 = vmatmul.f32.vlgmr.msra.gmra.mxu3 %v111_v35 }
 0x129   :  { %v160_v37 = vpop.f32.mrf.mxu1 }
 0x12a   :  { %v161_v38 = vadd.f32 %v226_v36, %v160_v37 }
 0x12c   :  { %166 = vst [vmem:[#allocation9] sm:$0xff] %v161_v38 }
 0x135   :  { %v163_v39 = vpop.f32.mrf.mxu3 }
 0x136   :  { %v164_v40 = vadd.f32 %v226_v36, %v163_v39 }
 0x138   :  { %167 = vst [vmem:[#allocation9 + $0x8] sm:$0xff] %v164_v40 }
 0x139   :  { %180 = dma.vmem_to_hbm [thread:$0]  %s173_s6, 256, %s175_s9, [#allocation5], %s330_s23, %s330_s23, %s331_s24  }
 0x13a   :  { %327 = dma.done.wait [#allocation5], 256  }
 0x13b   :  { %328 = vsyncadd [#allocation5], 4294967040 }
 0x13c   :  { %185 = vsyncpa [#allocation4], 1 }
 0x13d   :  { %186 = vsyncpa [#allocation7], 1 }
 0x13e   :  { %187 = vsyncpa [#allocation5], 1 }

// kernel: tpu_custom_call.1
= control target key start
LH: loop header
LB: loop body
LE: loop exit
PB: predicated region body
PF: predicated region fallthrough
CT: control target
= control target key end

     0   :  { %9 = vsyncpa [#allocation4], 0  ;;  %s387_s0 = inlined_call_operand.hbm [shape: f32[16,128], index: 0, kind: input, shape index: {}]   ;;  %s388_s1 = inlined_call_operand.hbm [shape: f32[128,128], index: 1, kind: input, shape index: {}]   ;;  %s389_s2 = inlined_call_operand.hbm [shape: f32[128,128], index: 2, kind: input, shape index: {}]   ;;  %s390_s3 = inlined_call_operand.vmem [shape: f32[1,128], index: 3, kind: input, shape index: {}]   ;;  %s391_s4 = inlined_call_operand.hbm [shape: f32[16,128], index: 4, kind: output, shape index: {}]  }
   0x1   :  { %10 = vsyncpa [#allocation7], 0 }
   0x2   :  { %11 = vsyncpa [#allocation5], 0  ;;  %s29_s17 = sshll.u32 %s388_s1, 4  ;;  %s329_s18 = smov [#allocation6]   ;;  %s30_s17 = int_to_ptr.hbm [resolvable:$true] %s29_s17 }
   0x3   :  { %s31_s19 = sshll.u32 %s329_s18, 4  ;;  %s16_s22 = sshll.u32 %s387_s0, 4  ;;  %s32_s19 = int_to_ptr.vmem [resolvable:$true] %s31_s19  ;;  %s17_s22 = int_to_ptr.hbm [resolvable:$true] %s16_s22 }
   0x4   :  { %s330_s23 = smov 128   ;;  %s331_s24 = smov 8  }
   0x5   :  { %37 = dma.hbm_to_vmem [thread:$0]  %s30_s17, 2048, %s32_s19, [#allocation7], %s330_s23, %s330_s23, %s331_s24  }
   0x6   :  { %s332_s25 = smov [#allocation3]   ;;  %s42_s1 = sshll.u32 %s389_s2, 4  ;;  %s43_s1 = int_to_ptr.hbm [resolvable:$true] %s42_s1 }
   0x7   :  { %s18_s26 = sshll.u32 %s332_s25, 4  ;;  %s333_s0 = smov [#allocation8]   ;;  %s19_s26 = int_to_ptr.vmem [resolvable:$true] %s18_s26 }
   0x8   :  { %24 = dma.hbm_to_vmem [thread:$0]  %s17_s22, 256, %s19_s26, [#allocation4], %s330_s23, %s330_s23, %s331_s24  }
   0x9   :  { %s44_s29 = sshll.u32 %s333_s0, 4  ;;  %s45_s29 = int_to_ptr.vmem [resolvable:$true] %s44_s29 }
   0xa   :  { %50 = dma.hbm_to_vmem [thread:$0]  %s43_s1, 2048, %s45_s29, [#allocation7], %s330_s23, %s330_s23, %s331_s24  }
   0xb   :  { %323 = dma.done.wait [#allocation4], 256  }
   0xc   :  { %324 = vsyncadd [#allocation4], 4294967040 }
   0xd   :  { %325 = dma.done.wait [#allocation7], 4096  }
   0xe   :  { %326 = vsyncadd [#allocation7], 4294963200  ;;  %v90_v0 = vld [vmem:[#allocation6 + $0x78] sm:$0xff]  ;;  %v89_v1 = vld [vmem:[#allocation6 + $0x70] sm:$0xff]  ;;  %s334_s5 = smov [#allocation9]   ;;  %s174_s9 = sshll.u32 %s391_s4, 4  ;;  %s175_s9 = int_to_ptr.hbm [resolvable:$true] %s174_s9 }
   0xf   :  { %188 = vmatpush.msra.mxu2 %v90_v0  ;;  %91 = vmatpush.msra.mxu0 %v90_v0  ;;  %v88_v2 = vld [vmem:[#allocation6 + $0x68] sm:$0xff]  ;;  %v87_v3 = vld [vmem:[#allocation6 + $0x60] sm:$0xff]  ;;  %v86_v4 = vld [vmem:[#allocation6 + $0x58] sm:$0xff]  ;;  %s172_s6 = sshll.u32 %s334_s5, 4  ;;  %s173_s6 = int_to_ptr.vmem [resolvable:$true] %s172_s6 }
  0x10   :  { %v138_v5 = vld [vmem:[#allocation8 + $0x78] sm:$0xff]  ;;  %v137_v6 = vld [vmem:[#allocation8 + $0x70] sm:$0xff]  ;;  %v136_v8 = vld [vmem:[#allocation8 + $0x68] sm:$0xff] }
  0x11   :  { %189 = vmatpush.msra.mxu2 %v89_v1  ;;  %92 = vmatpush.msra.mxu0 %v89_v1  ;;  %v85_v7 = vld [vmem:[#allocation6 + $0x50] sm:$0xff]  ;;  %v84_v9 = vld [vmem:[#allocation6 + $0x48] sm:$0xff]  ;;  %v135_v10 = vld [vmem:[#allocation8 + $0x60] sm:$0xff] }
  0x12   :  { %204 = vmatpush.msra.mxu3 %v138_v5  ;;  %143 = vmatpush.msra.mxu1 %v138_v5  ;;  %v83_v11 = vld [vmem:[#allocation6 + $0x40] sm:$0xff]  ;;  %v134_v12 = vld [vmem:[#allocation8 + $0x58] sm:$0xff]  ;;  %v133_v14 = vld [vmem:[#allocation8 + $0x50] sm:$0xff] }
  0x13   :  { %190 = vmatpush.msra.mxu2 %v88_v2  ;;  %93 = vmatpush.msra.mxu0 %v88_v2  ;;  %v82_v13 = vld [vmem:[#allocation6 + $0x38] sm:$0xff]  ;;  %v81_v15 = vld [vmem:[#allocation6 + $0x30] sm:$0xff]  ;;  %v132_v16 = vld [vmem:[#allocation8 + $0x48] sm:$0xff] }
  0x14   :  { %205 = vmatpush.msra.mxu3 %v137_v6  ;;  %144 = vmatpush.msra.mxu1 %v137_v6  ;;  %v80_v17 = vld [vmem:[#allocation6 + $0x28] sm:$0xff]  ;;  %v131_v18 = vld [vmem:[#allocation8 + $0x40] sm:$0xff]  ;;  %v130_v20 = vld [vmem:[#allocation8 + $0x38] sm:$0xff] }
  0x15   :  { %191 = vmatpush.msra.mxu2 %v87_v3  ;;  %94 = vmatpush.msra.mxu0 %v87_v3  ;;  %v79_v19 = vld [vmem:[#allocation6 + $0x20] sm:$0xff]  ;;  %v78_v21 = vld [vmem:[#allocation6 + $0x18] sm:$0xff]  ;;  %v129_v22 = vld [vmem:[#allocation8 + $0x30] sm:$0xff] }
  0x16   :  { %206 = vmatpush.msra.mxu3 %v136_v8  ;;  %145 = vmatpush.msra.mxu1 %v136_v8  ;;  %v77_v23 = vld [vmem:[#allocation6 + $0x10] sm:$0xff]  ;;  %v128_v24 = vld [vmem:[#allocation8 + $0x28] sm:$0xff]  ;;  %v127_v26 = vld [vmem:[#allocation8 + $0x20] sm:$0xff] }
  0x17   :  { %192 = vmatpush.msra.mxu2 %v86_v4  ;;  %95 = vmatpush.msra.mxu0 %v86_v4  ;;  %v76_v25 = vld [vmem:[#allocation6 + $0x8] sm:$0xff]  ;;  %v75_v27 = vld [vmem:[#allocation6] sm:$0xff]  ;;  %v74_v28 = vld [vmem:[#allocation3 + $0x8] sm:$0xff] }
  0x18   :  { %207 = vmatpush.msra.mxu3 %v135_v10  ;;  %146 = vmatpush.msra.mxu1 %v135_v10  ;;  %v73_v29 = vld [vmem:[#allocation3] sm:$0xff]  ;;  %v126_v30 = vld [vmem:[#allocation8 + $0x18] sm:$0xff]  ;;  %v124_v32 = vld [vmem:[#allocation8 + $0x8] sm:$0xff] }
  0x19   :  { %193 = vmatpush.msra.mxu2 %v85_v7  ;;  %96 = vmatpush.msra.mxu0 %v85_v7  ;;  %v125_v31 = vld [vmem:[#allocation8 + $0x10] sm:$0xff]  ;;  %v123_v33 = vld [vmem:[#allocation8] sm:$0xff] }
  0x1a   :  { %208 = vmatpush.msra.mxu3 %v134_v12  ;;  %147 = vmatpush.msra.mxu1 %v134_v12  ;;  %v226_v36 = vld [vmem:[%s390_s3] ss:$0 sm:$0xff] }
  0x1b   :  { %194 = vmatpush.msra.mxu2 %v84_v9  ;;  %97 = vmatpush.msra.mxu0 %v84_v9 }
  0x1c   :  { %209 = vmatpush.msra.mxu3 %v133_v14  ;;  %148 = vmatpush.msra.mxu1 %v133_v14 }
  0x1d   :  { %195 = vmatpush.msra.mxu2 %v83_v11  ;;  %98 = vmatpush.msra.mxu0 %v83_v11 }
  0x1e   :  { %210 = vmatpush.msra.mxu3 %v132_v16  ;;  %149 = vmatpush.msra.mxu1 %v132_v16 }
  0x1f   :  { %196 = vmatpush.msra.mxu2 %v82_v13  ;;  %99 = vmatpush.msra.mxu0 %v82_v13 }
  0x20   :  { %211 = vmatpush.msra.mxu3 %v131_v18  ;;  %150 = vmatpush.msra.mxu1 %v131_v18 }
  0x21   :  { %197 = vmatpush.msra.mxu2 %v81_v15  ;;  %100 = vmatpush.msra.mxu0 %v81_v15 }
  0x22   :  { %212 = vmatpush.msra.mxu3 %v130_v20  ;;  %151 = vmatpush.msra.mxu1 %v130_v20 }
  0x23   :  { %198 = vmatpush.msra.mxu2 %v80_v17  ;;  %101 = vmatpush.msra.mxu0 %v80_v17 }
  0x24   :  { %213 = vmatpush.msra.mxu3 %v129_v22  ;;  %152 = vmatpush.msra.mxu1 %v129_v22 }
  0x25   :  { %199 = vmatpush.msra.mxu2 %v79_v19  ;;  %102 = vmatpush.msra.mxu0 %v79_v19 }
  0x26   :  { %214 = vmatpush.msra.mxu3 %v128_v24  ;;  %153 = vmatpush.msra.mxu1 %v128_v24 }
  0x27   :  { %200 = vmatpush.msra.mxu2 %v78_v21  ;;  %103 = vmatpush.msra.mxu0 %v78_v21 }
  0x28   :  { %215 = vmatpush.msra.mxu3 %v127_v26  ;;  %154 = vmatpush.msra.mxu1 %v127_v26 }
  0x29   :  { %201 = vmatpush.msra.mxu2 %v77_v23  ;;  %104 = vmatpush.msra.mxu0 %v77_v23 }
  0x2a   :  { %216 = vmatpush.msra.mxu3 %v126_v30  ;;  %155 = vmatpush.msra.mxu1 %v126_v30 }
  0x2b   :  { %202 = vmatpush.msra.mxu2 %v76_v25  ;;  %105 = vmatpush.msra.mxu0 %v76_v25 }
  0x2c   :  { %217 = vmatpush.msra.mxu3 %v125_v31  ;;  %156 = vmatpush.msra.mxu1 %v125_v31 }
  0x2d   :  { %203 = vmatpush.msra.mxu2 %v75_v27  ;;  %106 = vmatpush.msra.mxu0 %v75_v27 }
  0x2e   :  { %110 = vmatmul.f32.vlgmr.msra.gmra.mxu2 %v74_v28  ;;  %107 = vmatmul.f32.vlgmr.msra.gmra.mxu0 %v73_v29 }
  0x2f   :  { %218 = vmatpush.msra.mxu3 %v124_v32  ;;  %157 = vmatpush.msra.mxu1 %v124_v32 }
  0x31   :  { %219 = vmatpush.msra.mxu3 %v123_v33  ;;  %158 = vmatpush.msra.mxu1 %v123_v33 }
  0xab   :  { %v108_v34 = vpop.f32.mrf.mxu0 }
  0xac   :  { %159 = vmatmul.f32.vlgmr.msra.gmra.mxu1 %v108_v34 }
  0xb1   :  { %v111_v35 = vpop.f32.mrf.mxu2 }
  0xb2   :  { %162 = vmatmul.f32.vlgmr.msra.gmra.mxu3 %v111_v35 }
 0x129   :  { %v160_v37 = vpop.f32.mrf.mxu1 }
 0x12a   :  { %v161_v38 = vadd.f32 %v226_v36, %v160_v37 }
 0x12c   :  { %166 = vst [vmem:[#allocation9] sm:$0xff] %v161_v38 }
 0x135   :  { %v163_v39 = vpop.f32.mrf.mxu3 }
 0x136   :  { %v164_v40 = vadd.f32 %v226_v36, %v163_v39 }
 0x138   :  { %167 = vst [vmem:[#allocation9 + $0x8] sm:$0xff] %v164_v40 }
 0x139   :  { %180 = dma.vmem_to_hbm [thread:$0]  %s173_s6, 256, %s175_s9, [#allocation5], %s330_s23, %s330_s23, %s331_s24  }
 0x13a   :  { %327 = dma.done.wait [#allocation5], 256  }
 0x13b   :  { %328 = vsyncadd [#allocation5], 4294967040 }
 0x13c   :  { %185 = vsyncpa [#allocation4], 1 }
 0x13d   :  { %186 = vsyncpa [#allocation7], 1 }
 0x13e   :  { %187 = vsyncpa [#allocation5], 1 }

</bundles_post_ra>
